<compile_context>
chip_gen: v7x
topology: tpu7x:2x2x1
jax: 0.10.0
libtpu: 0.0.40
codegen_flags: <defaults>
</compile_context>

<pallas_src>
import jax
import jax.numpy as jnp
from jax.experimental import pallas as pl
from jax.experimental.pallas import tpu as pltpu

LANE = 128      # lane width: pad every feature dim to a multiple of this
SUBLANE = 8     # pad the single activation row up to a full sublane group


def _round_up(n, m):
    return (n + m - 1) // m * m


def _fused_mlp_kernel(x_ref, w_ref, b_ref, o_ref, act_ref):
    """One grid step == one linear layer.

    x_ref  : (SUBLANE, MAX) f32   zero-padded flattened input (same block every step)
    w_ref  : (1, MAX, MAX) bf16   zero-padded W_l^T for the current layer
    b_ref  : (1, 1, MAX)   f32    zero-padded bias for the current layer
    o_ref  : (SUBLANE, MAX) f32   output block (written on the last layer only)
    act_ref: (SUBLANE, MAX) f32   VMEM-resident inter-layer activation (never hits HBM)
    """
    layer = pl.program_id(0)
    n_layers = pl.num_programs(0)

    # Load the flattened input into the activation scratch on the first layer.
    @pl.when(layer == 0)
    def _():
        act_ref[...] = x_ref[...]

    h = act_ref[...]                                   # (SUBLANE, MAX) f32
    w = w_ref[0]                                       # (MAX, MAX)     bf16
    y = jnp.dot(h.astype(w.dtype), w,
                preferred_element_type=jnp.float32)    # MXU, f32 accumulate
    y = y + b_ref[0]                                   # bias broadcast over rows (VPU)

    # Hidden layers: ReLU and keep the activation resident in VMEM for the next step.
    @pl.when(layer < n_layers - 1)
    def _():
        act_ref[...] = jnp.maximum(y, 0.0)

    # Last layer: no ReLU; write the raw affine output.
    @pl.when(layer == n_layers - 1)
    def _():
        o_ref[...] = y.astype(o_ref.dtype)


class LinearNetPallas:
    """JAX/Pallas re-implementation of the PyTorch LinearNet forward pass."""

    def __init__(self, layer_dims, key, weight_dtype=jnp.bfloat16):
        self.layer_dims = list(layer_dims)
        self.n_layers = len(layer_dims) - 1
        self.weight_dtype = weight_dtype
        # Common padded tile dim for all layers (>= 128 so last dims are lane-aligned).
        self.max_dim = max(_round_up(d, LANE) for d in self.layer_dims)
        MAX = self.max_dim

        w_stack = jnp.zeros((self.n_layers, MAX, MAX), jnp.float32)
        b_stack = jnp.zeros((self.n_layers, 1, MAX), jnp.float32)
        for i, (in_dim, out_dim) in enumerate(zip(layer_dims, layer_dims[1:])):
            key, wkey, bkey = jax.random.split(key, 3)
            # nn.Linear default init: U(-1/sqrt(in_dim), 1/sqrt(in_dim))
            bound = 1.0 / float(in_dim) ** 0.5
            w_pt = jax.random.uniform(wkey, (out_dim, in_dim), jnp.float32,
                                      minval=-bound, maxval=bound)
            b_pt = jax.random.uniform(bkey, (out_dim,), jnp.float32,
                                      minval=-bound, maxval=bound)
            # Store W^T, zero-padded into the (MAX, MAX) tile; zero padding keeps the
            # padded lanes exactly zero through every layer (0*w + 0 bias, ReLU(0)=0).
            w_stack = w_stack.at[i, :in_dim, :out_dim].set(w_pt.T)
            b_stack = b_stack.at[i, 0, :out_dim].set(b_pt)

        self.w_stack = w_stack.astype(weight_dtype)   # stream weights as bf16
        self.b_stack = b_stack                        # keep bias in f32

    def _vmem_limit_bytes(self):
        MAX = self.max_dim
        w_blk = MAX * MAX * jnp.dtype(self.weight_dtype).itemsize
        b_blk = MAX * 4
        io_blk = SUBLANE * MAX * 4
        # 2x for double-buffered inputs/outputs, + activation scratch, + headroom.
        need = 2 * (w_blk + b_blk + 2 * io_blk) + io_blk + (1 << 20)
        return int(min(max(need, 4 << 20), 32 << 20))

    def __call__(self, x):
        MAX = self.max_dim
        d0 = self.layer_dims[0]
        d_out = self.layer_dims[-1]

        # x.view(-1, 1).view(-1): flatten everything to a length-layer_dims[0] vector.
        v = jnp.reshape(x.astype(jnp.float32), (-1,))
        assert v.shape[0] == d0, (
            f"flattened input size {v.shape[0]} != layer_dims[0] {d0}")
        # Lane/sublane-padded (8, MAX) activation slab; only row 0 / first d0 lanes live.
        x_pad = jnp.zeros((SUBLANE, MAX), jnp.float32).at[0, :d0].set(v)

        out_pad = pl.pallas_call(
            _fused_mlp_kernel,
            out_shape=jax.ShapeDtypeStruct((SUBLANE, MAX), jnp.float32),
            grid_spec=pltpu.PrefetchScalarGridSpec(
                num_scalar_prefetch=0,
                grid=(self.n_layers,),
                in_specs=[
                    pl.BlockSpec((SUBLANE, MAX), lambda l: (0, 0)),     # x (resident)
                    pl.BlockSpec((1, MAX, MAX), lambda l: (l, 0, 0)),   # W_l (streamed)
                    pl.BlockSpec((1, 1, MAX), lambda l: (l, 0, 0)),     # b_l (streamed)
                ],
                out_specs=pl.BlockSpec((SUBLANE, MAX), lambda l: (0, 0)),
                scratch_shapes=[pltpu.VMEM((SUBLANE, MAX), jnp.float32)],
            ),
            compiler_params=pltpu.CompilerParams(
                dimension_semantics=("arbitrary",),   # layer axis carries the activation
                vmem_limit_bytes=self._vmem_limit_bytes(),
            ),
        )(x_pad, self.w_stack, self.b_stack)

        return out_pad[0, :d_out]   # result.view(-1), padding sliced off


def _reference_forward(net: LinearNetPallas, x):
    """Pure-JAX reference with identical numerics (bf16 weights/activations, f32 accum)."""
    v = jnp.reshape(x.astype(jnp.float32), (1, -1))
    for i, (in_dim, out_dim) in enumerate(zip(net.layer_dims, net.layer_dims[1:])):
        w = net.w_stack[i, :in_dim, :out_dim]          # bf16
        b = net.b_stack[i, 0, :out_dim]                # f32
        y = jnp.dot(v.astype(w.dtype), w, preferred_element_type=jnp.float32) + b
        v = y if i == net.n_layers - 1 else jnp.maximum(y, 0.0)
    return v[0]


if __name__ == "__main__":
    key = jax.random.PRNGKey(0)
    key, xkey, pkey = jax.random.split(key, 3)

    # Small shapes: input flattens to 32 elements -> layer dims [32, 64, 16].
    layer_dims = [32, 64, 16]
    x = jax.random.normal(xkey, (2, 4, 4), jnp.float32)  # 2*4*4 = 32 = layer_dims[0]

    net = LinearNetPallas(layer_dims, pkey)

    out = net(x)
    out = jax.block_until_ready(out)

    ref = _reference_forward(net, x)
    assert out.shape == (layer_dims[-1],), out.shape
    assert jnp.allclose(out, ref, atol=1e-2, rtol=1e-2), (out, ref)

    print("KERNEL_OK")
</pallas_src>

<mosaic_0001>
module attributes {stable_mosaic.version = 11 : i64} {
  func.func @_fused_mlp_kernel(%arg0: i32, %arg1: memref<8x128xf32, #tpu.memory_space<vmem>>, %arg2: memref<1x128x128xbf16, #tpu.memory_space<vmem>>, %arg3: memref<1x1x128xf32, #tpu.memory_space<vmem>>, %arg4: memref<8x128xf32, #tpu.memory_space<vmem>>, %arg5: memref<8x128xf32, #tpu.memory_space<vmem>>) attributes {dimension_semantics = [#tpu.dimension_semantics<arbitrary>], iteration_bounds = array<i64: 2>, scalar_prefetch = 0 : i64, scratch_operands = 1 : i64, tpu.core_type = #tpu.core_type<tc>, window_params = [{pipeline_mode = #tpu.pipeline_mode<synchronous>, transform_indices = @transform_0, window_bounds = array<i64: 8, 128>}, {transform_indices = @transform_1, window_bounds = array<i64: 1, 128, 128>}, {transform_indices = @transform_2, window_bounds = array<i64: 1, 1, 128>}, {pipeline_mode = #tpu.pipeline_mode<synchronous>, transform_indices = @transform_3, window_bounds = array<i64: 8, 128>}]} {
    %c0_i32 = arith.constant 0 : i32
    %0 = arith.cmpi eq, %arg0, %c0_i32 : i32
    %1 = arith.extui %0 : i1 to i32
    %c0_i32_0 = arith.constant 0 : i32
    %2 = arith.cmpi ne, %1, %c0_i32_0 : i32
    scf.if %2 {
      %c0_11 = arith.constant 0 : index
      %c0_12 = arith.constant 0 : index
      %18 = vector.load %arg1[%c0_11, %c0_12] : memref<8x128xf32, #tpu.memory_space<vmem>>, vector<8x128xf32>
      %c0_13 = arith.constant 0 : index
      %c0_14 = arith.constant 0 : index
      %19 = vector.load %arg5[%c0_13, %c0_14] : memref<8x128xf32, #tpu.memory_space<vmem>>, vector<8x128xf32>
      tpu.vector_store %arg5[%c0_13, %c0_14], %18 {strides = array<i32>} : memref<8x128xf32, #tpu.memory_space<vmem>>, vector<8x128xf32>,
    } else {
    }
    %c0 = arith.constant 0 : index
    %c0_1 = arith.constant 0 : index
    %3 = vector.load %arg5[%c0, %c0_1] : memref<8x128xf32, #tpu.memory_space<vmem>>, vector<8x128xf32>
    %c0_2 = arith.constant 0 : index
    %c0_3 = arith.constant 0 : index
    %c0_4 = arith.constant 0 : index
    %4 = vector.load %arg2[%c0_2, %c0_3, %c0_4] : memref<1x128x128xbf16, #tpu.memory_space<vmem>>, vector<1x128x128xbf16>
    %5 = vector.shape_cast %4 : vector<1x128x128xbf16> to vector<128x128xbf16>
    %6 = arith.truncf %3 : vector<8x128xf32> to vector<8x128xbf16>
    %cst = arith.constant dense<0.000000e+00> : vector<8x128xf32>
    %7 = tpu.matmul %6, %5, %cst {dimension_numbers = #tpu.dot_dimension_numbers<[1], [0], [0], [1], [0, 0, 1, 1], [], []>} : vector<8x128xbf16>, vector<128x128xbf16>, vector<8x128xf32> -> vector<8x128xf32>
    %c0_5 = arith.constant 0 : index
    %c0_6 = arith.constant 0 : index
    %c0_7 = arith.constant 0 : index
    %8 = vector.load %arg3[%c0_5, %c0_6, %c0_7] : memref<1x1x128xf32, #tpu.memory_space<vmem>>, vector<1x1x128xf32>
    %9 = vector.shape_cast %8 : vector<1x1x128xf32> to vector<1x128xf32>
    %10 = vector.broadcast %9 : vector<1x128xf32> to vector<8x128xf32>
    %11 = arith.addf %7, %10 : vector<8x128xf32>
    %c1_i32 = arith.constant 1 : i32
    %12 = arith.cmpi slt, %arg0, %c1_i32 : i32
    %13 = arith.extui %12 : i1 to i32
    %c0_i32_8 = arith.constant 0 : i32
    %14 = arith.cmpi ne, %13, %c0_i32_8 : i32
    scf.if %14 {
      %cst_11 = arith.constant 0.000000e+00 : f32
      %18 = vector.broadcast %cst_11 : f32 to vector<8x128xf32>
      %19 = arith.maximumf %11, %18 : vector<8x128xf32>
      %c0_12 = arith.constant 0 : index
      %c0_13 = arith.constant 0 : index
      %20 = vector.load %arg5[%c0_12, %c0_13] : memref<8x128xf32, #tpu.memory_space<vmem>>, vector<8x128xf32>
      tpu.vector_store %arg5[%c0_12, %c0_13], %19 {strides = array<i32>} : memref<8x128xf32, #tpu.memory_space<vmem>>, vector<8x128xf32>,
    } else {
    }
    %c1_i32_9 = arith.constant 1 : i32
    %15 = arith.cmpi eq, %arg0, %c1_i32_9 : i32
    %16 = arith.extui %15 : i1 to i32
    %c0_i32_10 = arith.constant 0 : i32
    %17 = arith.cmpi ne, %16, %c0_i32_10 : i32
    scf.if %17 {
      %c0_11 = arith.constant 0 : index
      %c0_12 = arith.constant 0 : index
      %18 = vector.load %arg4[%c0_11, %c0_12] : memref<8x128xf32, #tpu.memory_space<vmem>>, vector<8x128xf32>
      tpu.vector_store %arg4[%c0_11, %c0_12], %11 {strides = array<i32>} : memref<8x128xf32, #tpu.memory_space<vmem>>, vector<8x128xf32>,
    } else {
    }
    return
  }
  func.func @transform_0(%arg0: i32) -> (i32, i32) {
    %c0_i32 = arith.constant 0 : i32
    %c0_i32_0 = arith.constant 0 : i32
    %c0_i32_1 = arith.constant 0 : i32
    return %c0_i32, %c0_i32_0 : i32, i32
  }
  func.func @transform_1(%arg0: i32) -> (i32, i32, i32) {
    %c0_i32 = arith.constant 0 : i32
    %c0_i32_0 = arith.constant 0 : i32
    %c0_i32_1 = arith.constant 0 : i32
    return %arg0, %c0_i32, %c0_i32_0 : i32, i32, i32
  }
  func.func @transform_2(%arg0: i32) -> (i32, i32, i32) {
    %c0_i32 = arith.constant 0 : i32
    %c0_i32_0 = arith.constant 0 : i32
    %c0_i32_1 = arith.constant 0 : i32
    return %arg0, %c0_i32, %c0_i32_0 : i32, i32, i32
  }
  func.func @transform_3(%arg0: i32) -> (i32, i32) {
    %c0_i32 = arith.constant 0 : i32
    %c0_i32_0 = arith.constant 0 : i32
    %c0_i32_1 = arith.constant 0 : i32
    return %c0_i32, %c0_i32_0 : i32, i32
  }
}

</mosaic_0001>

<bundles_post_ra>
// kernel: tpu_custom_call.1
= control target key start
LH: loop header
LB: loop body
LE: loop exit
PB: predicated region body
PF: predicated region fallthrough
CT: control target
= control target key end

     0   :  { %8 = vsyncpa [#allocation4], 0  ;;  %s887_s0 = inlined_call_operand.hbm [shape: f32[8,128], index: 0, kind: input, shape index: {}]   ;;  %s888_s1 = inlined_call_operand.hbm [shape: bf16[2,128,128], index: 1, kind: input, shape index: {}]   ;;  %s889_s2 = inlined_call_operand.vmem [shape: f32[2,1,128], index: 2, kind: input, shape index: {}]   ;;  %s890_s3 = inlined_call_operand.hbm [shape: f32[8,128], index: 3, kind: output, shape index: {}]  }
   0x1   :  { %9 = vsyncpa [#allocation7], 0 }
   0x2   :  { %11 = vsyncpa [#allocation7 + $0x1], 0 }
   0x3   :  { %12 = vsyncpa [#allocation5], 0  ;;  %s693_s12 = smov 0   ;;  %s695_s13 = smov 0  }
   0x4   :  { %s697_s14 = smov 0   ;;  %s699_s15 = smov 0  }
   0x5 LB: > { %s712_s16 = sadd.s32 4294967295, %s664_s15   ;;  %s715_s17 = sadd.s32 1, %s664_s15   ;;  %s664_s15 = sphi %s699_s15, %s909_s15   ;;  %s660_s14 = sphi %s697_s14, %s908_s14   ;;  %s656_s13 = sphi %s695_s13, %s907_s13   ;;  %s652_s12 = sphi %s693_s12, %s906_s12  }
   0x6   : > { %s43_s18 = ssub.s32 %s664_s15, %s715_s17  ;;  %s46_s19 = sadd.s32 1, %s660_s14 }
   0x7   : > { %p44_p0 = scmp.eq.s32.totalorder %s43_s18, 0  ;;  %p53_p1 = scmp.ne.s32.totalorder %s660_s14, %s656_s13 }
   0x8   : > { %p54_p2 = scmp.eq.s32.totalorder %s664_s15, 0  ;;  %p59_p3 = scmp.ne.s32.totalorder %s656_s13, %s652_s12 }
   0x9   : > { %s725_s20 = scalar_select %p44_p0, %s660_s14, %s46_s19  }
   0xa   : > { %p727_p4 = por %p54_p2, %p53_p1  ;;  %p891_p5 = scmp.eq.s32.totalorder %s712_s16, 0 }
   0xb   : > { %p414_p6 = scmp.ge.s32.totalorder %s664_s15, 1  ;;  %p117_p7 = scmp.lt.s32.totalorder %s664_s15, 3 }
   0xc   : > { %p736_p8 = por %p891_p5, %p59_p3  ;;  %s666_s24 = smov [#allocation3]  }
   0xd   : > { %p741_p10 = pnand %p414_p6, %p117_p7  ;;  %s130_s25 = sshll.u32 %s666_s24, 4  ;;  %s131_s25 = int_to_ptr.vmem [resolvable:$true] %s130_s25 }
   0xe   : > { %s896_s22 = scalar_select %p736_p8, 1, 0 }
   0xf   : > { %s897_s23 = scalar_select %p741_p10, 1, 0 }
  0x10   : > { %p479_p11 = pneg %p741_p10  ;;  %p488_p12 = scmp.lt.s32.totalorder %s664_s15, 2 }
  0x11   : > { %s141_s26 = sand.u32 1, %s660_s14   ;;  %s538_s5 = scalar_lea.hbm %s887_s0, 128 }
  0x12   : > { %p751_p13 = pnand %p479_p11, %p891_p5  ;;  %p757_p0 = pnand %p488_p12, %p727_p4 }
  0x13   : > { %s417_s29 = sshll.u32 %s141_s26, 6  ;;  %p539_p1 = scmp.ne.s32.totalorder %s887_s0, %s538_s5 }
  0x14   : > { %s899_s28 = scalar_select %p757_p0, 1, 0 }
  0x15   : > { %p540_p2 = pneg %p751_p13  ;;  %p545_p4 = scmp.lt.u32.totalorder %s538_s5, %s887_s0 }
  0x17   : > { %p541_p3 = pnand %p540_p2, %p539_p1 }
  0x19   : > { %p542_p6 = pneg %p541_p3 }
  0x1b   : > { %p547_p7 = pnand %p545_p4, %p542_p6 }
  0x1d   : > { %550 = shalt.err (!%p547_p7)
}
  0x1e   : > { %s551_s10 = scalar_lea.vmem %s131_s25, 128  ;;  %p559_p5 = scmp.lt.s32.totalorder %s131_s25, %s131_s25 }
  0x1f   : > { %p552_p11 = scmp.ne.s32.totalorder %s131_s25, %s551_s10  ;;  %p560_p8 = scmp.lt.s32.totalorder %s551_s10, %s551_s10 }
  0x21   : > { %p554_p12 = pnand %p552_p11, %p540_p2  ;;  %p561_p10 = por %p560_p8, %p559_p5 }
  0x23   : > { %p555_p9 = pneg %p554_p12 }
  0x25   : > { %p562_p0 = pnand %p561_p10, %p555_p9 }
  0x27   : > { %565 = shalt.err (!%p562_p0)
}
  0x28   : > { %482 = dma.hbm_to_vmem [thread:$0]  (!%p751_p13), %s887_s0, 128, %s131_s25, [#allocation4]  }
  0x29   : > { %s439_s18 = sshll.u32 %s664_s15, 10  ;;  %s145_s30 = scalar_lea.vmem [#allocation6], %s417_s29 }
  0x2a   : > { %s781_s24 = scalar_lea.hbm %s888_s1, %s439_s18  ;;  %s152_s4 = sshll.u32 %s145_s30, 4  ;;  %s783_s4 = int_to_ptr.vmem [resolvable:$true] %s152_s4 }
  0x2b   : > { %s785_s27 = scalar_lea.sflag [#allocation7], %s141_s26  ;;  %s566_s5 = scalar_lea.hbm %s781_s24, 1024 }
  0x2c   : > { %p567_p5 = scmp.ne.s32.totalorder %s781_s24, %s566_s5  ;;  %p900_p8 = scmp.ne.s32.totalorder %s899_s28, 0 }
  0x2d   : > { %s571_s6 = scalar_lea.hbm %s888_s1, 2048  ;;  %p572_p0 = scmp.lt.u32.totalorder %s781_s24, %s888_s1 }
  0x2e   : > { %p568_p9 = pneg %p900_p8  ;;  %p573_p1 = scmp.lt.u32.totalorder %s571_s6, %s566_s5 }
  0x2f   : > { %p575_p3 = scmp.lt.u32.totalorder %s566_s5, %s781_s24 }
  0x30   : > { %p569_p10 = pnand %p568_p9, %p567_p5  ;;  %p574_p2 = por %p573_p1, %p572_p0 }
  0x32   : > { %p570_p13 = pneg %p569_p10  ;;  %p576_p6 = por %p575_p3, %p574_p2 }
  0x34   : > { %p577_p4 = pnand %p576_p6, %p570_p13 }
  0x36   : > { %580 = shalt.err (!%p577_p4)
}
  0x37   : > { %s581_s26 = scalar_lea.vmem %s783_s4, 1024  ;;  %s667_s29 = smov [#allocation6]  }
  0x38   : > { %p582_p7 = scmp.ne.s32.totalorder %s783_s4, %s581_s26  ;;  %s586_s9 = sshll.u32 %s667_s29, 4  ;;  %s587_s9 = int_to_ptr.vmem [resolvable:$false] %s586_s9 }
  0x39   : > { %s588_s10 = scalar_lea.vmem %s587_s9, 2048  ;;  %p589_p5 = scmp.lt.s32.totalorder %s783_s4, %s587_s9 }
  0x3a   : > { %p584_p11 = pnand %p582_p7, %p568_p9  ;;  %p590_p10 = scmp.lt.s32.totalorder %s588_s10, %s581_s26 }
  0x3c   : > { %p585_p12 = pneg %p584_p11  ;;  %p591_p0 = por %p590_p10, %p589_p5 }
  0x3e   : > { %p592_p1 = pnand %p591_p0, %p585_p12 }
  0x40   : > { %595 = shalt.err (!%p592_p1)
}
  0x41   : > { %s668_s11 = smov 64   ;;  %s669_s12 = smov 4  }
  0x42   : > { %486 = dma.hbm_to_vmem [thread:$0]  (!%p900_p8), %s781_s24, 1024, %s783_s4, %s785_s27, %s668_s11, %s668_s11, %s669_s12  }
  0x43   : > { %p901_p9 = scmp.ne.s32.totalorder %s897_s23, 0 }
  0x44   : > { %p902_p13 = scmp.eq.s32.totalorder (!%p901_p9), %s712_s16, 0 }
  0x45   : > { %170 = sbr.rel (%p901_p9) target bundleno = 375 (0x177), region = 32 }
  0x4c   : > { %639 = dma.done.wait (%p902_p13), [#allocation4], 128   ;;  %p903_p2 = pmov %p902_p13 }
  0x4d   : > { %s176_s18 = sand.u32 1, %s656_s13   ;;  %p904_p3 = scmp.ne.s32.totalorder %s896_s22, 0 }
  0x4e   : > { %641 = vsyncadd (%p903_p2), [#allocation4], 4294967168  ;;  %s422_s19 = sshll.u32 %s176_s18, 6  ;;  %s177_s21 = scalar_lea.sflag [#allocation7], %s176_s18 }
  0x4f   : > { %s820_s30 = scalar_lea.vmem [#allocation6], %s422_s19 }
  0x50   : > { %643 = dma.done.wait (%p904_p3), %s177_s21, 1024  }
  0x51   : > { %645 = vsyncadd (%p904_p3), %s177_s21, 4294966272  ;;  %p201_p8 = scmp.lt.s32.totalorder %s712_s16, 1  ;;  %p905_p6 = scmp.ne.s32.totalorder %s712_s16, 0 }
  0x52   : > { %v209_v0 = vld [vmem:[#allocation3] sm:$0xff] (!%p905_p6) }
  0x53   : > { %s828_s23 = scalar_select %p201_p8, %s712_s16, 1 }
  0x54   : > { %208 = sbr.rel (%p905_p6) target bundleno = 91 (0x5b), region = 44  ;;  %210 = vst [vmem:[#allocation2] sm:$0xff] (!%p905_p6), %v209_v0 }
  0x55   : > { %s203_s4 = scalar_lea.vmem %s889_s2, %s828_s23 }
  0x5b PF: > { %v530_v1 = vld [vmem:[%s820_s30] sm:$0xff]   ;;  %v670_v2 = vmov 0.0   ;;  %v531_v3 = vld [vmem:[%s820_s30 + $0x8] sm:$0xff]   ;;  %vm671_vm0 = vmmov 0   ;;  %v532_v4 = vld [vmem:[%s820_s30 + $0x10] sm:$0xff]   ;;  %p433_p4 = scmp.ge.s32.totalorder %s712_s16, 1 }
  0x5c   : > { %449 = vmatprep.subr.bf16.mxu0 %v670_v2  ;;  %465 = vmatprep.mubr.msk.bf16.mxu0 %vm671_vm0, %v670_v2  ;;  %v533_v5 = vld [vmem:[%s820_s30 + $0x18] sm:$0xff]   ;;  %v534_v6 = vld [vmem:[%s820_s30 + $0x20] sm:$0xff]   ;;  %v535_v7 = vld [vmem:[%s820_s30 + $0x28] sm:$0xff]  }
  0x5d   : > { %450 = vmatpush3.bf16.msra.mxu0 %v530_v1  ;;  %v536_v8 = vld [vmem:[%s820_s30 + $0x30] sm:$0xff]   ;;  %v537_v9 = vld [vmem:[%s820_s30 + $0x38] sm:$0xff]  }
  0x5e   : > { %451 = vmatprep.subr.bf16.mxu0 %v670_v2  ;;  %v211_v10 = vld [vmem:[#allocation2] sm:$0xff] }
  0x5f   : > { %v228_v11 = vpack.c.bf16 %v211_v10, %v211_v10  ;;  %v424_v12 = vld [vmem:[%s203_s4] ss:$0 sm:$0xff] }
  0x61   : > { %452 = vmatpush3.bf16.msra.mxu0 %v531_v3 }
  0x62   : > { %453 = vmatprep.subr.bf16.mxu0 %v670_v2 }
  0x65   : > { %454 = vmatpush3.bf16.msra.mxu0 %v532_v4 }
  0x66   : > { %455 = vmatprep.subr.bf16.mxu0 %v670_v2 }
  0x69   : > { %456 = vmatpush3.bf16.msra.mxu0 %v533_v5 }
  0x6a   : > { %457 = vmatprep.subr.bf16.mxu0 %v670_v2 }
  0x6d   : > { %458 = vmatpush3.bf16.msra.mxu0 %v534_v6 }
  0x6e   : > { %459 = vmatprep.subr.bf16.mxu0 %v670_v2 }
  0x71   : > { %460 = vmatpush3.bf16.msra.mxu0 %v535_v7 }
  0x72   : > { %461 = vmatprep.subr.bf16.mxu0 %v670_v2 }
  0x75   : > { %462 = vmatpush3.bf16.msra.mxu0 %v536_v8 }
  0x76   : > { %463 = vmatprep.subr.bf16.mxu0 %v670_v2 }
  0x79   : > { %464 = vmatpush3.bf16.msra.mxu0 %v537_v9 }
  0x7c   : > { %466 = vmatmul.mubr.bf16.vlgmr.msra.gmra.mrb[0].mxu0 %v228_v11 }
 0x14c   : > { %327 = sbr.rel (%p433_p4) target bundleno = 341 (0x155), region = 48 }
 0x14f   : > { %v318_v13 = vpop.f32.mrb[0].mxu0 }
 0x150   : > { %v319_v14 = vadd.f32 %v424_v12, %v318_v13  ;;  %v467_v15 = vpop.f32.mrb[1].mxu0 }
 0x151   : > { %v321_v16 = vpop.f32.mrb[2].mxu0 }
 0x152   : > { %v468_v17 = vpop.f32.mrb[3].mxu0  ;;  %v328_v18 = vmax.f32 (!%p433_p4), %v319_v14, 0.0 }
 0x154   : > { %329 = vst [vmem:[#allocation2] sm:$0xff] %v328_v18 }
 0x155 PF: > { %p434_p7 = scmp.ne.s32.totalorder %s712_s16, 1 }
 0x156   : > { %334 = vst [vmem:[#allocation8] sm:$0xff] (!%p434_p7), %v319_v14 }
 0x157   : > { %333 = sbr.rel (%p434_p7) target bundleno = 350 (0x15e), region = 52 }
 0x15e PF: > { %p490_p11 = scmp.eq.s32.totalorder %s712_s16, 1  ;;  %s672_s5 = smov [#allocation8]  }
 0x15f   : > { %s342_s15 = sshll.u32 %s672_s5, 4  ;;  %s343_s15 = int_to_ptr.vmem [resolvable:$true] %s342_s15 }
 0x160   : > { %s596_s25 = scalar_lea.vmem %s343_s15, 128  ;;  %p603_p0 = scmp.lt.s32.totalorder %s343_s15, %s343_s15 }
 0x161   : > { %p597_p12 = scmp.ne.s32.totalorder %s343_s15, %s596_s25  ;;  %p604_p1 = scmp.lt.s32.totalorder %s596_s25, %s596_s25 }
 0x163   : > { %p598_p5 = pnand %p597_p12, %p490_p11  ;;  %p605_p9 = por %p604_p1, %p603_p0 }
 0x165   : > { %p599_p10 = pneg %p598_p5 }
 0x167   : > { %p606_p13 = pnand %p605_p9, %p599_p10 }
 0x169   : > { %609 = shalt.err (!%p606_p13)
}
 0x16a   : > { %s610_s8 = scalar_lea.hbm %s890_s3, 128 }
 0x16b   : > { %p611_p2 = scmp.ne.s32.totalorder %s890_s3, %s610_s8  ;;  %p616_p6 = scmp.lt.u32.totalorder %s610_s8, %s890_s3 }
 0x16d   : > { %p612_p3 = pnand %p611_p2, %p490_p11 }
 0x16f   : > { %p613_p8 = pneg %p612_p3 }
 0x171   : > { %p618_p4 = pnand %p616_p6, %p613_p8 }
 0x173   : > { %621 = shalt.err (!%p618_p4)
}
 0x174   : > { %476 = dma.vmem_to_hbm [thread:$0]  (%p490_p11), %s343_s15, 128, %s890_s3, [#allocation5]  }
 0x175   : > { %647 = dma.done.wait (%p490_p11), [#allocation5], 128  }
 0x176   : > { %649 = vsyncadd (%p490_p11), [#allocation5], 4294967168 }
 0x177 PF: > { %p15_p7 = scmp.ge.s32.totalorder %s715_s17, 4   ;;  %s906_s12 = smov %s656_s13 }
 0x178   : > { %s907_s13 = smov %s660_s14  ;;  %s908_s14 = smov %s725_s20 }
 0x179   : > { %s909_s15 = smov %s715_s17  ;;  %17 = sbr.rel (!%p15_p7) target bundleno = 5 (0x5), region = 89 }
 0x180   :  { %355 = vsyncpa [#allocation4], 1 }
 0x181   :  { %357 = vsyncpa [#allocation4 + $0x1], 1 }
 0x182   :  { %358 = vsyncpa [#allocation7], 1 }
 0x183   :  { %360 = vsyncpa [#allocation7 + $0x1], 1 }
 0x184   :  { %361 = vsyncpa [#allocation5], 1 }
 0x185   :  { %363 = vsyncpa [#allocation5 + $0x1], 1 }

</bundles_post_ra>
